<compile_context>
chip_gen: v5e
topology: v5e:2x2
jax: 0.10.0
libtpu: 0.0.40
codegen_flags: <defaults>
</compile_context>

<pallas_src>
import jax
import jax.numpy as jnp
import numpy as np
from jax.experimental import pallas as pl
from jax.experimental.pallas import tpu as pltpu

# ---- model / problem sizes (small, consistent with the module) --------------
N_NODES = 16      # number of graph nodes
IN_FEATS = 32
OUT_FEATS = 16
NUM_HEADS = 4
NEG_SLOPE = 0.2   # LeakyReLU negative slope (module default)


# ------------------------------- Pallas kernel -------------------------------
def gat_kernel(h_ref, w_ref, a_ref, adj_ref, bias_ref, mask_ref, out_ref):
    """Single-invocation GAT forward.

    h_ref    : (N, F_in)        node features (post feat_drop, rate=0)
    w_ref    : (F_in, H*D)      fc weight (transposed vs. torch Linear)
    a_ref    : (H*D, 2H)        block-diagonal [attn_l | attn_r] projection
    adj_ref  : (H*N, N)         adjacency tiled per head, adj[dst, src] in {0,1}
    bias_ref : (H*N, N)         additive mask: 0 on edges, -1e30 off edges
    mask_ref : (H*N, H*D)       head-block selection mask for fused aggregation
    out_ref  : (N, H*D)         aggregated node embeddings
    """
    n = h_ref.shape[0]
    nh = NUM_HEADS

    # fc: (N, F_in) @ (F_in, H*D) -> (N, H*D)                       [MXU #1]
    feat = jnp.dot(h_ref[...], w_ref[...], preferred_element_type=jnp.float32)

    # attention projections for all heads at once:
    # elr[:, h] = el_h, elr[:, H+h] = er_h                          [MXU #2]
    elr = jnp.dot(feat, a_ref[...], preferred_element_type=jnp.float32)  # (N, 2H)

    # single transpose so the source term lives on the lane axis     [XLU x1]
    el_t = jnp.transpose(elr[:, :nh])                                    # (H, N)

    # e_stack[h*N + dst, src] = er[dst, h] + el[src, h]
    blocks = []
    for head in range(nh):                       # 4 cheap slices + broadcast adds
        er_col = elr[:, nh + head:nh + head + 1]     # (N, 1)  destination term
        el_row = el_t[head:head + 1, :]              # (1, N)  source term
        blocks.append(er_col + el_row)               # (N, N)
    e = jnp.concatenate(blocks, axis=0)              # (H*N, N), head-stacked

    # LeakyReLU (slope in (0,1)  ->  max(x, slope*x))
    e = jnp.maximum(e, NEG_SLOPE * e)

    # masked softmax over incoming edges, batched over all heads
    s = e + bias_ref[...]                            # additive -1e30 mask
    m = jnp.max(s, axis=1, keepdims=True)            # (H*N, 1)
    p = jnp.exp(s - m) * adj_ref[...]                # exact 0 off-graph (safe for
                                                     # zero-in-degree destinations)
    denom = jnp.sum(p, axis=1, keepdims=True)        # (H*N, 1)
    # Exact normalization (approx EUP reciprocal was the source of the
    # tolerance failure); denom is only H*N scalars, so this is cheap.
    p = p / jnp.maximum(denom, 1e-9)

    # fused aggregation for all heads: (H*N, N) @ (N, H*D)          [MXU #3]
    agg = jnp.dot(p, feat, preferred_element_type=jnp.float32)    # (H*N, H*D)
    agg = agg * mask_ref[...]                        # keep matching-head blocks

    out = agg[0:n, :]
    for head in range(1, nh):                        # fold head rows: 3 adds
        out = out + agg[head * n:(head + 1) * n, :]

    out_ref[...] = out                               # one lane-dense full store

    # TODO(synk): dropout (feat_drop/attn_drop), residual branch, activation,
    # and the cluster_centroid attention variant are inactive under the module
    # defaults and are not implemented in the kernel.


# ------------------------------- wrapper --------------------------------------
@jax.jit
def centroid_gat_conv(h, w_t, attn_l, attn_r, adj):
    n, _ = h.shape
    nh, d = NUM_HEADS, OUT_FEATS
    hd = nh * d

    # Block-diagonal attention projection matrix: (H*D, 2H)
    #   a_blk[h*D + k, h]      = attn_l[h, k]
    #   a_blk[h*D + k, H + h]  = attn_r[h, k]
    eye = jnp.eye(nh, dtype=jnp.float32)
    a_l = (attn_l[:, :, None] * eye[:, None, :]).reshape(hd, nh)
    a_r = (attn_r[:, :, None] * eye[:, None, :]).reshape(hd, nh)
    a_blk = jnp.concatenate([a_l, a_r], axis=1)                  # (H*D, 2H)

    # Additive softmax mask and exact-zero multiplicative mask, tiled per head.
    bias = jnp.where(adj > 0, 0.0, -1e30).astype(jnp.float32)    # (N, N)
    adj_stack = jnp.tile(adj.astype(jnp.float32), (nh, 1))       # (H*N, N)
    bias_stack = jnp.tile(bias, (nh, 1))                         # (H*N, N)

    # Head-block selection mask for the fused aggregation matmul: (H*N, H*D)
    row_head = jnp.arange(nh * n)[:, None] // n
    col_head = jnp.arange(hd)[None, :] // d
    blk_mask = (row_head == col_head).astype(jnp.float32)

    out = pl.pallas_call(
        gat_kernel,
        out_shape=jax.ShapeDtypeStruct((n, hd), jnp.float32),
        in_specs=[pl.BlockSpec(memory_space=pltpu.MemorySpace.VMEM)] * 6,
        out_specs=pl.BlockSpec(memory_space=pltpu.MemorySpace.VMEM),
        compiler_params=pltpu.CompilerParams(vmem_limit_bytes=32 * 1024 * 1024),
    )(h, w_t, a_blk, adj_stack, bias_stack, blk_mask)

    # TODO(synk): for many graphs / timesteps, add a leading batch grid axis
    # marked "parallel" (uses both v7x TensorCores, amortizes launch cost)
    # instead of one tiny call per graph.
    return out.reshape(n, nh, d)        # (N, H, D_out), matches torch output


# --------------------------- pure-JAX reference -------------------------------
def ref_forward(h, w_t, attn_l, attn_r, adj):
    n = h.shape[0]
    feat = (h @ w_t).reshape(n, NUM_HEADS, OUT_FEATS)
    el = (feat * attn_l[None]).sum(-1)                  # (N, H)
    er = (feat * attn_r[None]).sum(-1)                  # (N, H)
    e = er[:, None, :] + el[None, :, :]                 # (dst, src, H)
    e = jnp.where(e >= 0, e, NEG_SLOPE * e)
    s = jnp.where(adj[:, :, None] > 0, e, -1e30)
    m = s.max(axis=1, keepdims=True)
    p = jnp.exp(s - m) * adj[:, :, None]
    denom = p.sum(axis=1, keepdims=True)
    a = p / jnp.maximum(denom, 1e-9)
    return jnp.einsum('ijh,jhd->ihd', a, feat)


# ----------------------------------- main -------------------------------------
if __name__ == "__main__":
    key = jax.random.PRNGKey(0)
    k_h, k_w, k_al, k_ar = jax.random.split(key, 4)

    # Deterministic "xavier_normal_(gain=sqrt(2))"-style parameter init
    gain = float(np.sqrt(2.0))
    hd = NUM_HEADS * OUT_FEATS
    std_fc = gain * np.sqrt(2.0 / (IN_FEATS + hd))
    std_attn = gain * np.sqrt(2.0 / (NUM_HEADS * OUT_FEATS + OUT_FEATS))

    # fc weight stored transposed relative to torch Linear: (F_in, H*D)
    w_t = (std_fc * jax.random.normal(k_w, (IN_FEATS, hd))).astype(jnp.float32)
    # attn params: torch shape (1, H, D) -> stored as (H, D)
    attn_l = (std_attn * jax.random.normal(k_al, (NUM_HEADS, OUT_FEATS))).astype(jnp.float32)
    attn_r = (std_attn * jax.random.normal(k_ar, (NUM_HEADS, OUT_FEATS))).astype(jnp.float32)

    # Input node features (N, F_in)
    h = jax.random.normal(k_h, (N_NODES, IN_FEATS), dtype=jnp.float32)

    # Deterministic graph: ring with self-loops. adj[dst, src].
    adj_np = np.zeros((N_NODES, N_NODES), dtype=np.float32)
    for i in range(N_NODES):
        adj_np[i, i] = 1.0
        adj_np[i, (i - 1) % N_NODES] = 1.0
        adj_np[i, (i + 1) % N_NODES] = 1.0
    adj = jnp.asarray(adj_np)

    out = centroid_gat_conv(h, w_t, attn_l, attn_r, adj)
    out = jax.block_until_ready(out)

    ref = jax.block_until_ready(ref_forward(h, w_t, attn_l, attn_r, adj))
    # Exact softmax normalization in the kernel -> remaining differences are
    # only fp32 accumulation-order effects; a tight tolerance is now safe.
    np.testing.assert_allclose(np.asarray(out), np.asarray(ref), rtol=1e-3, atol=1e-4)

    print("KERNEL_OK")
</pallas_src>

<mosaic_0001>
module attributes {stable_mosaic.version = 11 : i64} {
  func.func @gat_kernel(%arg0: memref<16x32xf32, #tpu.memory_space<vmem>>, %arg1: memref<32x64xf32, #tpu.memory_space<vmem>>, %arg2: memref<64x8xf32, #tpu.memory_space<vmem>>, %arg3: memref<64x16xf32, #tpu.memory_space<vmem>>, %arg4: memref<64x16xf32, #tpu.memory_space<vmem>>, %arg5: memref<64x64xf32, #tpu.memory_space<vmem>>, %arg6: memref<16x64xf32, #tpu.memory_space<vmem>>) attributes {dimension_semantics = [], scalar_prefetch = 0 : i64, scratch_operands = 0 : i64, tpu.core_type = #tpu.core_type<tc>} {
    %c0 = arith.constant 0 : index
    %c0_0 = arith.constant 0 : index
    %0 = vector.load %arg0[%c0, %c0_0] : memref<16x32xf32, #tpu.memory_space<vmem>>, vector<16x32xf32>
    %c0_1 = arith.constant 0 : index
    %c0_2 = arith.constant 0 : index
    %1 = vector.load %arg1[%c0_1, %c0_2] : memref<32x64xf32, #tpu.memory_space<vmem>>, vector<32x64xf32>
    %cst = arith.constant dense<0.000000e+00> : vector<16x64xf32>
    %2 = tpu.matmul %0, %1, %cst {dimension_numbers = #tpu.dot_dimension_numbers<[1], [0], [0], [1], [0, 0, 1, 1], [], []>} : vector<16x32xf32>, vector<32x64xf32>, vector<16x64xf32> -> vector<16x64xf32>
    %c0_3 = arith.constant 0 : index
    %c0_4 = arith.constant 0 : index
    %3 = vector.load %arg2[%c0_3, %c0_4] : memref<64x8xf32, #tpu.memory_space<vmem>>, vector<64x8xf32>
    %cst_5 = arith.constant dense<0.000000e+00> : vector<16x8xf32>
    %4 = tpu.matmul %2, %3, %cst_5 {dimension_numbers = #tpu.dot_dimension_numbers<[1], [0], [0], [1], [0, 0, 1, 1], [], []>} : vector<16x64xf32>, vector<64x8xf32>, vector<16x8xf32> -> vector<16x8xf32>
    %5 = vector.extract_strided_slice %4 {offsets = [0, 0], sizes = [16, 4], strides = [1, 1]} : vector<16x8xf32> to vector<16x4xf32>
    %6 = tpu.transpose %5, [1, 0] : vector<16x4xf32> -> vector<4x16xf32>
    %7 = vector.extract_strided_slice %4 {offsets = [0, 4], sizes = [16, 1], strides = [1, 1]} : vector<16x8xf32> to vector<16x1xf32>
    %8 = vector.extract_strided_slice %6 {offsets = [0, 0], sizes = [1, 16], strides = [1, 1]} : vector<4x16xf32> to vector<1x16xf32>
    %9 = vector.broadcast %7 : vector<16x1xf32> to vector<16x16xf32>
    %10 = vector.broadcast %8 : vector<1x16xf32> to vector<16x16xf32>
    %11 = arith.addf %9, %10 : vector<16x16xf32>
    %12 = vector.extract_strided_slice %4 {offsets = [0, 5], sizes = [16, 1], strides = [1, 1]} : vector<16x8xf32> to vector<16x1xf32>
    %13 = vector.extract_strided_slice %6 {offsets = [1, 0], sizes = [1, 16], strides = [1, 1]} : vector<4x16xf32> to vector<1x16xf32>
    %14 = vector.broadcast %12 : vector<16x1xf32> to vector<16x16xf32>
    %15 = vector.broadcast %13 : vector<1x16xf32> to vector<16x16xf32>
    %16 = arith.addf %14, %15 : vector<16x16xf32>
    %17 = vector.extract_strided_slice %4 {offsets = [0, 6], sizes = [16, 1], strides = [1, 1]} : vector<16x8xf32> to vector<16x1xf32>
    %18 = vector.extract_strided_slice %6 {offsets = [2, 0], sizes = [1, 16], strides = [1, 1]} : vector<4x16xf32> to vector<1x16xf32>
    %19 = vector.broadcast %17 : vector<16x1xf32> to vector<16x16xf32>
    %20 = vector.broadcast %18 : vector<1x16xf32> to vector<16x16xf32>
    %21 = arith.addf %19, %20 : vector<16x16xf32>
    %22 = vector.extract_strided_slice %4 {offsets = [0, 7], sizes = [16, 1], strides = [1, 1]} : vector<16x8xf32> to vector<16x1xf32>
    %23 = vector.extract_strided_slice %6 {offsets = [3, 0], sizes = [1, 16], strides = [1, 1]} : vector<4x16xf32> to vector<1x16xf32>
    %24 = vector.broadcast %22 : vector<16x1xf32> to vector<16x16xf32>
    %25 = vector.broadcast %23 : vector<1x16xf32> to vector<16x16xf32>
    %26 = arith.addf %24, %25 : vector<16x16xf32>
    %27 = tpu.concatenate %11, %16, %21, %26 in 0 : vector<16x16xf32>, vector<16x16xf32>, vector<16x16xf32>, vector<16x16xf32> -> vector<64x16xf32>
    %cst_6 = arith.constant 2.000000e-01 : f32
    %28 = vector.broadcast %cst_6 : f32 to vector<64x16xf32>
    %29 = arith.mulf %28, %27 : vector<64x16xf32>
    %30 = arith.maximumf %27, %29 : vector<64x16xf32>
    %c0_7 = arith.constant 0 : index
    %c0_8 = arith.constant 0 : index
    %31 = vector.load %arg4[%c0_7, %c0_8] : memref<64x16xf32, #tpu.memory_space<vmem>>, vector<64x16xf32>
    %32 = arith.addf %30, %31 : vector<64x16xf32>
    %cst_9 = arith.constant dense<0xFF800000> : vector<64xf32>
    %33 = vector.multi_reduction <maximumf>, %32, %cst_9 [1] : vector<64x16xf32> to vector<64xf32>
    %34 = vector.shape_cast %33 : vector<64xf32> to vector<64x1xf32>
    %35 = vector.broadcast %34 : vector<64x1xf32> to vector<64x16xf32>
    %36 = arith.subf %32, %35 : vector<64x16xf32>
    %37 = math.exp %36 : vector<64x16xf32>
    %c0_10 = arith.constant 0 : index
    %c0_11 = arith.constant 0 : index
    %38 = vector.load %arg3[%c0_10, %c0_11] : memref<64x16xf32, #tpu.memory_space<vmem>>, vector<64x16xf32>
    %39 = arith.mulf %37, %38 : vector<64x16xf32>
    %cst_12 = arith.constant dense<0.000000e+00> : vector<64xf32>
    %40 = vector.multi_reduction <add>, %39, %cst_12 [1] : vector<64x16xf32> to vector<64xf32>
    %41 = vector.shape_cast %40 : vector<64xf32> to vector<64x1xf32>
    %cst_13 = arith.constant 9.99999971E-10 : f32
    %42 = vector.broadcast %cst_13 : f32 to vector<64x1xf32>
    %43 = arith.maximumf %41, %42 : vector<64x1xf32>
    %44 = vector.broadcast %43 : vector<64x1xf32> to vector<64x16xf32>
    %45 = arith.divf %39, %44 : vector<64x16xf32>
    %cst_14 = arith.constant dense<0.000000e+00> : vector<64x64xf32>
    %46 = tpu.matmul %45, %2, %cst_14 {dimension_numbers = #tpu.dot_dimension_numbers<[1], [0], [0], [1], [0, 0, 1, 1], [], []>} : vector<64x16xf32>, vector<16x64xf32>, vector<64x64xf32> -> vector<64x64xf32>
    %c0_15 = arith.constant 0 : index
    %c0_16 = arith.constant 0 : index
    %47 = vector.load %arg5[%c0_15, %c0_16] : memref<64x64xf32, #tpu.memory_space<vmem>>, vector<64x64xf32>
    %48 = arith.mulf %46, %47 : vector<64x64xf32>
    %49 = vector.extract_strided_slice %48 {offsets = [0, 0], sizes = [16, 64], strides = [1, 1]} : vector<64x64xf32> to vector<16x64xf32>
    %50 = vector.extract_strided_slice %48 {offsets = [16, 0], sizes = [16, 64], strides = [1, 1]} : vector<64x64xf32> to vector<16x64xf32>
    %51 = arith.addf %49, %50 : vector<16x64xf32>
    %52 = vector.extract_strided_slice %48 {offsets = [32, 0], sizes = [16, 64], strides = [1, 1]} : vector<64x64xf32> to vector<16x64xf32>
    %53 = arith.addf %51, %52 : vector<16x64xf32>
    %54 = vector.extract_strided_slice %48 {offsets = [48, 0], sizes = [16, 64], strides = [1, 1]} : vector<64x64xf32> to vector<16x64xf32>
    %55 = arith.addf %53, %54 : vector<16x64xf32>
    %c0_17 = arith.constant 0 : index
    %c0_18 = arith.constant 0 : index
    %56 = vector.load %arg6[%c0_17, %c0_18] : memref<16x64xf32, #tpu.memory_space<vmem>>, vector<16x64xf32>
    tpu.vector_store %arg6[%c0_17, %c0_18], %55 {strides = array<i32>} : memref<16x64xf32, #tpu.memory_space<vmem>>, vector<16x64xf32>,
    return
  }
}

</mosaic_0001>

<bundles_post_ra>
// kernel: centroid_gat_conv.1
= control target key start
LH: loop header
LB: loop body
LE: loop exit
PB: predicated region body
PF: predicated region fallthrough
CT: control target
= control target key end

     0   :  { %vm29_vm0 = vcmask 261120   ;;  %v576_v14 = vmov 5   ;;  %v577_v15 = vmov 4   ;;  %vm67_vm1 = vcmask 523264   ;;  %s828_s1 = inlined_call_operand.vmem [shape: f32[32,64], index: 1, kind: input, shape index: {}]   ;;  %s829_s2 = inlined_call_operand.vmem [shape: f32[64,8], index: 2, kind: input, shape index: {}]   ;;  %s830_s0 = inlined_call_operand.vmem [shape: f32[16,32], index: 0, kind: input, shape index: {}]   ;;  %s831_s4 = inlined_call_operand.vmem [shape: f32[64,16], index: 4, kind: input, shape index: {}]   ;;  %s832_s3 = inlined_call_operand.vmem [shape: f32[64,16], index: 3, kind: input, shape index: {}]   ;;  %s833_s5 = inlined_call_operand.vmem [shape: f32[64,64], index: 5, kind: input, shape index: {}]   ;;  %s834_s6 = inlined_call_operand.vmem [shape: f32[16,64], index: 6, kind: output, shape index: {}]  }
   0x1   :  { %v28_v0 = vld [vmem:[%s828_s1 + $0x18] sm:$0xff]  ;;  %v27_v1 = vld [vmem:[%s828_s1 + $0x10] sm:$0xff]  ;;  %v26_v2 = vld [vmem:[%s828_s1 + $0x8] sm:$0xff]  ;;  %538 = vset.pattern.permute.xlu2 %v576_v14  ;;  %536 = vset.pattern.permute.xlu0 %v577_v15  ;;  %v578_v20 = vmov 7   ;;  %v579_v21 = vmov 6   ;;  %vm207_vm2 = vcmask 130048  }
   0x2   :  { %48 = vmatpush.msra.mxu0 %v28_v0  ;;  %v66_v3 = vld [vmem:[%s829_s2 + $0x38] sm:$0xff]  ;;  %v65_v4 = vld [vmem:[%s829_s2 + $0x30] sm:$0xff]  ;;  %v25_v5 = vld [vmem:[%s828_s1] sm:$0xff]  ;;  %540 = vset.pattern.permute.xlu1 %v577_v15 }
   0x3   :  { %82 = vmatpush.msra.mxu1 %v66_v3  ;;  %v64_v6 = vld [vmem:[%s829_s2 + $0x28] sm:$0xff]  ;;  %v23_v7 = vld [vmem:[%s830_s0] sm:$0xff]  ;;  %v62_v9 = vld [vmem:[%s829_s2 + $0x18] sm:$0xff] }
   0x4   :  { %49 = vmatpush.msra.mxu0 %v27_v1  ;;  %v63_v8 = vld [vmem:[%s829_s2 + $0x20] sm:$0xff]  ;;  %v61_v10 = vld [vmem:[%s829_s2 + $0x10] sm:$0xff]  ;;  %v60_v11 = vld [vmem:[%s829_s2 + $0x8] sm:$0xff] }
   0x5   :  { %83 = vmatpush.msra.mxu1 %v65_v4  ;;  %v24_v12 = vld [vmem:[%s830_s0 + $0x8] sm:$0xff]  ;;  %v59_v13 = vld [vmem:[%s829_s2] sm:$0xff]  ;;  %v193_v42 = vld [vmem:[%s831_s4 + $0x10] sm:$0xff] }
   0x6   :  { %50 = vmatpush.msra.mxu0 %v26_v2  ;;  %v195_v41 = vld [vmem:[%s831_s4 + $0x20] sm:$0xff]  ;;  %v194_v56 = vld [vmem:[%s831_s4 + $0x18] sm:$0xff]  ;;  %v192_v59 = vld [vmem:[%s831_s4 + $0x8] sm:$0xff] }
   0x7   :  { %84 = vmatpush.msra.mxu1 %v64_v6  ;;  %v191_v43 = vld [vmem:[%s831_s4] sm:$0xff]  ;;  %v196_v4 = vld [vmem:[%s831_s4 + $0x28] sm:$0xff] }
   0x8   :  { %51 = vmatpush.msra.mxu0 %v25_v5 }
   0x9   :  { %517 = vmatmul.msk.f32.vlgmr.msra.gmra.mxu0 %vm29_vm0, %v23_v7  ;;  %85 = vmatpush.msra.mxu1 %v63_v8 }
   0xb   :  { %86 = vmatpush.msra.mxu1 %v62_v9 }
   0xd   :  { %87 = vmatpush.msra.mxu1 %v61_v10 }
   0xf   :  { %88 = vmatpush.msra.mxu1 %v60_v11  ;;  %v197_v11 = vld [vmem:[%s831_s4 + $0x30] sm:$0xff] }
  0x11   :  { %518 = vmatmul.msk.f32.gmra.mxu0 %vm29_vm0, %v24_v12  ;;  %89 = vmatpush.msra.mxu1 %v59_v13 }
  0x86   :  { %v53_v16 = vpop.f32.mrf.mxu0 }
  0x87   :  { %519 = vmatmul.msk.f32.vlgmr.msra.gmra.mxu1 %vm67_vm1, %v53_v16 }
  0x8e   :  { %v56_v17 = vpop.f32.mrf.mxu0 }
  0x8f   :  { %520 = vmatmul.msk.f32.gmra.mxu1 %vm67_vm1, %v56_v17  ;;  %462 = vmatpush.msra.mxu2 %v56_v17 }
  0x90   :  { %529 = vmatpush.msra.mxu3 %v56_v17 }
  0x91   :  { %463 = vmatpush.msra.mxu2 %v53_v16 }
  0x92   :  { %530 = vmatpush.msra.mxu3 %v53_v16  ;;  %v198_v16 = vld [vmem:[%s831_s4 + $0x38] sm:$0xff] }
 0x104   :  { %v91_v18 = vpop.f32.mrf.mxu1 }
 0x105   :  { %143 = vperm.xlu2 %538, %v91_v18   ;;  %131 = vperm.xlu0 %536, %v91_v18  }
 0x10c   :  { %v94_v19 = vpop.f32.mrf.mxu1 }
 0x10d   :  { %539 = vset.pattern.permute.xlu2 %v578_v20  ;;  %537 = vset.pattern.permute.xlu0 %v579_v21 }
 0x10e   :  { %136 = vperm.xlu1 %540, %v94_v19   ;;  %165 = vperm.xlu2 %539, %v91_v18  }
 0x10f   :  { %154 = vperm.xlu0 %537, %v91_v18  }
 0x116   :  { %541 = vset.pattern.permute.xlu1 %v579_v21  ;;  %542 = vset.pattern.permute.xlu2 %v576_v14 }
 0x117   :  { %543 = vset.pattern.permute.xlu0 %v578_v20  ;;  %158 = vperm.xlu1 %541, %v94_v19  }
 0x118   :  { %169 = vperm.xlu0 %543, %v94_v19   ;;  %147 = vperm.xlu2 %542, %v94_v19  }
 0x14c   :  { %97 = vxpose.xlu1.b32.start [1/2] (short) (narrow) %v91_v18, 8 }
 0x154   :  { %98 = vxpose.xlu1.b32.end [2/2] (short) (narrow) %v94_v19, 8 }
 0x15f   :  { %v144_v22 = vpop.permute.xlu2 %143 }
 0x168   :  { %v166_v24 = vpop.permute.xlu2 %165 }
 0x172   :  { %v148_v31 = vpop.permute.xlu2 %147 }
 0x177   :  { %v132_v25 = vpop.permute.xlu0 %131 }
 0x180   :  { %v137_v23 = vpop.permute.xlu1 %136 }
 0x181   :  { %v155_v32 = vpop.permute.xlu0 %154 }
 0x189   :  { %v159_v26 = vpop.permute.xlu1 %158 }
 0x18a   :  { %v170_v7 = vpop.permute.xlu0 %169 }
 0x1f0   :  { %v113_v27 = vpop.trf.xlu1 }
 0x1f1   :  { %v139_v28 = vperm.slane %v113_v27, 0  ;;  %v150_v29 = vperm.slane %v113_v27, 1  ;;  %v161_v30 = vperm.slane %v113_v27, 2  ;;  %v172_v61 = vperm.slane %v113_v27, 3  ;;  %v260_v27 = vld [vmem:[%s832_s3 + $0x20] sm:$0xff] }
 0x1f3   :  { %v162_v33 = vadd.f32 %v161_v30, %v155_v32  ;;  %v151_v34 = vadd.f32 %v150_v29, %v144_v22  ;;  %v140_v35 = vadd.f32 %v139_v28, %v132_v25  ;;  %v152_v36 = vadd.f32 %v150_v29, %v148_v31  ;;  %v256_v31 = vld [vmem:[%s832_s3] sm:$0xff] }
 0x1f4   :  { %v141_v37 = vadd.f32 %v139_v28, %v137_v23  ;;  %v163_v58 = vadd.f32 %v161_v30, %v159_v26  ;;  %v173_v3 = vadd.f32 %v172_v61, %v166_v24  ;;  %v174_v10 = vadd.f32 %v172_v61, %v170_v7  ;;  %v263_v7 = vld [vmem:[%s832_s3 + $0x38] sm:$0xff] }
 0x1f5   :  { %v179_v38 = vmul.f32 0.2, %v162_v33  ;;  %v177_v39 = vmul.f32 0.2, %v151_v34  ;;  %v175_v40 = vmul.f32 0.2, %v140_v35 }
 0x1f6   :  { %v178_v47 = vmul.f32 0.2, %v152_v36  ;;  %v176_v48 = vmul.f32 0.2, %v141_v37  ;;  %v180_v63 = vmul.f32 0.2, %v163_v58 }
 0x1f7   :  { %v187_v44 = vmax.f32 %v162_v33, %v179_v38  ;;  %v185_v45 = vmax.f32 %v151_v34, %v177_v39  ;;  %v183_v46 = vmax.f32 %v140_v35, %v175_v40  ;;  %v181_v6 = vmul.f32 0.2, %v173_v3 }
 0x1f8   :  { %v186_v55 = vmax.f32 %v152_v36, %v178_v47  ;;  %v184_v57 = vmax.f32 %v141_v37, %v176_v48  ;;  %v188_v2 = vmax.f32 %v163_v58, %v180_v63  ;;  %v182_v13 = vmul.f32 0.2, %v174_v10 }
 0x1f9   :  { %v203_v49 = vadd.f32 %v195_v41, %v187_v44  ;;  %v668_v50 = vadd.f32 %v193_v42, %v185_v45  ;;  %v199_v51 = vadd.f32 %v191_v43, %v183_v46  ;;  %v189_v9 = vmax.f32 %v173_v3, %v181_v6  ;;  %v257_v42 = vld [vmem:[%s832_s3 + $0x8] sm:$0xff] }
 0x1fa   :  { %v680_v60 = vadd.f32 %v194_v56, %v186_v55  ;;  %v200_v62 = vadd.f32 %v192_v59, %v184_v57  ;;  %v204_v5 = vadd.f32 %v196_v4, %v188_v2  ;;  %v190_v15 = vmax.f32 %v174_v10, %v182_v13 }
 0x1fb   :  { %v220_v52 = vsel %vm207_vm2, %v203_v49, -inf  ;;  %v214_v53 = vsel %vm207_vm2, %v668_v50, -inf  ;;  %v208_v54 = vsel %vm207_vm2, %v199_v51, -inf  ;;  %v205_v12 = vadd.f32 %v197_v11, %v189_v9 }
 0x1fc   :  { %221 = vmax.xlane.f32.xlu0 %v220_v52  ;;  %215 = vmax.xlane.f32.xlu1 %v214_v53  ;;  %v217_v0 = vsel %vm207_vm2, %v680_v60, -inf  ;;  %v211_v1 = vsel %vm207_vm2, %v200_v62, -inf  ;;  %v223_v8 = vsel %vm207_vm2, %v204_v5, -inf  ;;  %v696_v17 = vadd.f32 %v198_v16, %v190_v15  ;;  %v261_v53 = vld [vmem:[%s832_s3 + $0x28] sm:$0xff] }
 0x1fd   :  { %209 = vmax.xlane.f32.xlu2 %v208_v54  ;;  %v226_v14 = vsel %vm207_vm2, %v205_v12, -inf }
 0x1fe   :  { %v229_v18 = vsel %vm207_vm2, %v696_v17, -inf }
 0x204   :  { %218 = vmax.xlane.f32.xlu0 %v217_v0  ;;  %v262_v0 = vld [vmem:[%s832_s3 + $0x30] sm:$0xff] }
 0x205   :  { %212 = vmax.xlane.f32.xlu2 %v211_v1 }
 0x20d   :  { %224 = vmax.xlane.f32.xlu2 %v223_v8 }
 0x215   :  { %227 = vmax.xlane.f32.xlu2 %v226_v14 }
 0x21d   :  { %230 = vmax.xlane.f32.xlu2 %v229_v18 }
 0x26f   :  { %v222_v19 = vpop.xlane.xlu0 %221  ;;  %v216_v25 = vpop.xlane.xlu1 %215 }
 0x270   :  { %v236_v20 = vsub.f32 %v203_v49, %v222_v19  ;;  %v210_v21 = vpop.xlane.xlu2 %209  ;;  %v234_v30 = vsub.f32 %v668_v50, %v216_v25 }
 0x271   :  { %v232_v22 = vsub.f32 %v199_v51, %v210_v21  ;;  %v258_v51 = vld [vmem:[%s832_s3 + $0x10] sm:$0xff] }
 0x272   :  { %v248_v23 = vmul.f32 1.442695, %v236_v20  ;;  %v244_v37 = vmul.f32 1.442695, %v234_v30 }
 0x273   :  { %v240_v24 = vmul.f32 1.442695, %v232_v22 }
 0x274   :  { %544 = vpow2.f32 %v248_v23 }
 0x275   :  { %546 = vpow2.f32 %v240_v24 }
 0x277   :  { %v219_v38 = vpop.xlane.xlu0 %218 }
 0x278   :  { %v213_v26 = vpop.xlane.xlu2 %212  ;;  %v235_v43 = vsub.f32 %v680_v60, %v219_v38 }
 0x279   :  { %v233_v28 = vsub.f32 %v200_v62, %v213_v26  ;;  %v259_v62 = vld [vmem:[%s832_s3 + $0x18] sm:$0xff] }
 0x27a   :  { %v545_v29 = vpop.eup %544  ;;  %v246_v47 = vmul.f32 1.442695, %v235_v43 }
 0x27b   :  { %v242_v32 = vmul.f32 1.442695, %v233_v28  ;;  %v707_v33 = vmul.f32 %v545_v29, %v260_v27  ;;  %v547_v34 = vpop.eup %546 }
 0x27c   :  { %v711_v36 = vmul.f32 %v547_v34, %v256_v31 }
 0x27d   :  { %548 = vpow2.f32 %v242_v32  ;;  %v284_v35 = vsel %vm207_vm2, %v707_v33, 0.0 }
 0x27e   :  { %285 = vadd.xlane.f32.xlu2 %v284_v35  ;;  %v272_v39 = vsel %vm207_vm2, %v711_v36, 0.0  ;;  %550 = vpow2.f32 %v244_v37 }
 0x27f   :  { %273 = vadd.xlane.f32.xlu0 %v272_v39 }
 0x280   :  { %v225_v40 = vpop.xlane.xlu2 %224 }
 0x281   :  { %v237_v41 = vsub.f32 %v204_v5, %v225_v40 }
 0x283   :  { %v549_v44 = vpop.eup %548  ;;  %v250_v45 = vmul.f32 1.442695, %v237_v41 }
 0x284   :  { %v719_v46 = vmul.f32 %v549_v44, %v257_v42  ;;  %v551_v49 = vpop.eup %550 }
 0x285   :  { %552 = vpow2.f32 %v250_v45  ;;  %v729_v56 = vmul.f32 %v551_v49, %v258_v51 }
 0x286   :  { %v275_v48 = vsel %vm207_vm2, %v719_v46, 0.0  ;;  %554 = vpow2.f32 %v246_v47 }
 0x287   :  { %276 = vadd.xlane.f32.xlu0 %v275_v48  ;;  %v278_v59 = vsel %vm207_vm2, %v729_v56, 0.0 }
 0x288   :  { %v228_v50 = vpop.xlane.xlu2 %227 }
 0x289   :  { %v238_v52 = vsub.f32 %v205_v12, %v228_v50 }
 0x28b   :  { %v553_v54 = vpop.eup %552  ;;  %v252_v55 = vmul.f32 1.442695, %v238_v52 }
 0x28c   :  { %v731_v57 = vmul.f32 %v553_v54, %v261_v53  ;;  %v555_v60 = vpop.eup %554 }
 0x28d   :  { %556 = vpow2.f32 %v252_v55  ;;  %v744_v3 = vmul.f32 %v555_v60, %v259_v62 }
 0x28e   :  { %v287_v58 = vsel %vm207_vm2, %v731_v57, 0.0 }
 0x28f   :  { %288 = vadd.xlane.f32.xlu2 %v287_v58  ;;  %279 = vadd.xlane.f32.xlu0 %v278_v59  ;;  %v281_v6 = vsel %vm207_vm2, %v744_v3, 0.0 }
 0x290   :  { %v231_v61 = vpop.xlane.xlu2 %230 }
 0x291   :  { %v239_v63 = vsub.f32 %v696_v17, %v231_v61 }
 0x293   :  { %v557_v1 = vpop.eup %556  ;;  %v254_v2 = vmul.f32 1.442695, %v239_v63 }
 0x294   :  { %v746_v4 = vmul.f32 %v557_v1, %v262_v0 }
 0x295   :  { %558 = vpow2.f32 %v254_v2 }
 0x296   :  { %v290_v5 = vsel %vm207_vm2, %v746_v4, 0.0 }
 0x297   :  { %291 = vadd.xlane.f32.xlu2 %v290_v5  ;;  %282 = vadd.xlane.f32.xlu0 %v281_v6 }
 0x29b   :  { %v559_v8 = vpop.eup %558 }
 0x29c   :  { %v755_v9 = vmul.f32 %v559_v8, %v263_v7 }
 0x29e   :  { %v293_v10 = vsel %vm207_vm2, %v755_v9, 0.0 }
 0x29f   :  { %294 = vadd.xlane.f32.xlu2 %v293_v10 }
 0x2f1   :  { %v286_v11 = vpop.xlane.xlu2 %285 }
 0x2f2   :  { %v300_v12 = vmax.f32 %v286_v11, 1e-09  ;;  %v274_v13 = vpop.xlane.xlu0 %273 }
 0x2f3   :  { %v296_v14 = vmax.f32 %v274_v13, 1e-09 }
 0x2f4   :  { %560 = vrcp.f32 %v300_v12  ;;  %v375_v22 = vand.u32 2147483648, %v300_v12  ;;  %v373_v25 = vand.u32 2147483647, %v300_v12  ;;  %vm369_vm5 = vweird.f32 %v300_v12 }
 0x2f5   :  { %562 = vrcp.f32 %v296_v14  ;;  %v313_v26 = vand.u32 2147483647, %v296_v14  ;;  %v315_v27 = vand.u32 2147483648, %v296_v14  ;;  %vm309_vm6 = vweird.f32 %v296_v14 }
 0x2f6   :  { %v376_v31 = vor.u32 1.1754944e-38, %v375_v22  ;;  %vm374_vm8 = vcmp.eq.f32.partialorder %v373_v25, 8.507059e+37 }
 0x2f7   :  { %vm314_vm10 = vcmp.eq.f32.partialorder %v313_v26, 8.507059e+37  ;;  %v316_v40 = vor.u32 1.1754944e-38, %v315_v27 }
 0x2fa   :  { %v561_v15 = vpop.eup %560  ;;  %v277_v17 = vpop.xlane.xlu0 %276 }
 0x2fb   :  { %v365_v16 = vmul.f32 %v561_v15, %v300_v12  ;;  %v563_v18 = vpop.eup %562  ;;  %v297_v19 = vmax.f32 %v277_v17, 1e-09  ;;  %vm370_vm3 = vweird.f32 %v561_v15 }
 0x2fc   :  { %v305_v20 = vmul.f32 %v563_v18, %v296_v14  ;;  %vm310_vm4 = vweird.f32 %v563_v18  ;;  %vm371_vm7 = vmor %vm369_vm5, %vm370_vm3 }
 0x2fd   :  { %v366_v21 = vsub.f32 1.0, %v365_v16  ;;  %564 = vrcp.f32 %v297_v19  ;;  %vm311_vm9 = vmor %vm309_vm6, %vm310_vm4  ;;  %v330_v49 = vand.u32 2147483648, %v297_v19  ;;  %v328_v51 = vand.u32 2147483647, %v297_v19 }
 0x2fe   :  { %v306_v23 = vsub.f32 1.0, %v305_v20  ;;  %vm324_vm12 = vweird.f32 %v297_v19 }
 0x2ff   :  { %v367_v24 = vmul.f32 %v561_v15, %v366_v21  ;;  %vm329_vm14 = vcmp.eq.f32.partialorder %v328_v51, 8.507059e+37 }
 0x300   :  { %v307_v28 = vmul.f32 %v563_v18, %v306_v23 }
 0x301   :  { %v368_v29 = vadd.f32 %v561_v15, %v367_v24 }
 0x302   :  { %v289_v30 = vpop.xlane.xlu2 %288  ;;  %v280_v32 = vpop.xlane.xlu0 %279  ;;  %v308_v35 = vadd.f32 %v563_v18, %v307_v28 }
 0x303   :  { %v759_v34 = vmax.f32 %v289_v30, 1e-09  ;;  %v372_v37 = vsel %vm371_vm7, %v561_v15, %v368_v29  ;;  %v565_v38 = vpop.eup %564  ;;  %v298_v39 = vmax.f32 %v280_v32, 1e-09 }
 0x304   :  { %v377_v41 = vsel %vm374_vm8, %v376_v31, %v372_v37  ;;  %v320_v42 = vmul.f32 %v565_v38, %v297_v19  ;;  %v312_v43 = vsel %vm311_vm9, %v563_v18, %v308_v35  ;;  %vm325_vm11 = vweird.f32 %v565_v38 }
 0x305   :  { %566 = vrcp.f32 %v759_v34  ;;  %v378_v44 = vmul.f32 %v377_v41, %v707_v33  ;;  %v317_v45 = vsel %vm314_vm10, %v316_v40, %v312_v43  ;;  %vm326_vm13 = vmor %vm324_vm12, %vm325_vm11  ;;  %v343_v5 = vand.u32 2147483647, %v298_v39 }
 0x306   :  { %568 = vrcp.f32 %v298_v39  ;;  %v321_v47 = vsub.f32 1.0, %v320_v42  ;;  %v318_v48 = vmul.f32 %v317_v45, %v711_v36  ;;  %v331_v36 = vor.u32 1.1754944e-38, %v330_v49 }
 0x307   :  { %525 = vmatmul.msk.f32.vlgmr.msra.gmra.mxu3 %vm207_vm2, %v378_v44  ;;  %v390_v6 = vand.u32 2147483648, %v759_v34  ;;  %v345_v7 = vand.u32 2147483648, %v298_v39  ;;  %v388_v10 = vand.u32 2147483647, %v759_v34  ;;  %vm339_vm3 = vweird.f32 %v298_v39 }
 0x308   :  { %521 = vmatmul.msk.f32.vlgmr.msra.gmra.mxu2 %vm207_vm2, %v318_v48  ;;  %v322_v50 = vmul.f32 %v565_v38, %v321_v47  ;;  %vm384_vm4 = vweird.f32 %v759_v34  ;;  %vm344_vm5 = vcmp.eq.f32.partialorder %v343_v5, 8.507059e+37  ;;  %v492_v5 = vld [vmem:[%s833_s5 + $0x18] sm:$0xff] }
 0x309   :  { %v391_v16 = vor.u32 1.1754944e-38, %v390_v6  ;;  %v346_v19 = vor.u32 1.1754944e-38, %v345_v7  ;;  %vm389_vm8 = vcmp.eq.f32.partialorder %v388_v10, 8.507059e+37  ;;  %v490_v6 = vld [vmem:[%s833_s5 + $0x8] sm:$0xff] }
 0x30a   :  { %v292_v52 = vpop.xlane.xlu2 %291  ;;  %v283_v54 = vpop.xlane.xlu0 %282  ;;  %v323_v58 = vadd.f32 %v565_v38, %v322_v50 }
 0x30b   :  { %v567_v53 = vpop.eup %566  ;;  %v766_v55 = vmax.f32 %v292_v52, 1e-09  ;;  %v769_v60 = vmax.f32 %v283_v54, 1e-09 }
 0x30c   :  { %v569_v33 = vpop.eup %568  ;;  %v380_v59 = vmul.f32 %v567_v53, %v759_v34  ;;  %v327_v62 = vsel %vm326_vm13, %v565_v38, %v323_v58  ;;  %vm385_vm15 = vweird.f32 %v567_v53 }
 0x30d   :  { %v335_v61 = vmul.f32 %v569_v33, %v298_v39  ;;  %570 = vrcp.f32 %v766_v55  ;;  %v332_v0 = vsel %vm329_vm14, %v331_v36, %v327_v62  ;;  %vm340_vm0 = vweird.f32 %v569_v33  ;;  %vm386_vm6 = vmor %vm384_vm4, %vm385_vm15 }
 0x30e   :  { %v381_v63 = vsub.f32 1.0, %v380_v59  ;;  %572 = vrcp.f32 %v769_v60  ;;  %v333_v2 = vmul.f32 %v332_v0, %v719_v46  ;;  %vm341_vm7 = vmor %vm339_vm3, %vm340_vm0  ;;  %v405_v29 = vand.u32 2147483648, %v766_v55  ;;  %v491_v59 = vld [vmem:[%s833_s5 + $0x10] sm:$0xff] }
 0x30f   :  { %v336_v1 = vsub.f32 1.0, %v335_v61  ;;  %v360_v30 = vand.u32 2147483648, %v769_v60  ;;  %v403_v32 = vand.u32 2147483647, %v766_v55  ;;  %v358_v35 = vand.u32 2147483647, %v769_v60 }
 0x310   :  { %v382_v8 = vmul.f32 %v567_v53, %v381_v63  ;;  %522 = vmatmul.msk.f32.gmra.mxu2 %vm207_vm2, %v333_v2  ;;  %vm399_vm11 = vweird.f32 %v766_v55  ;;  %vm354_vm12 = vweird.f32 %v769_v60  ;;  %v406_v38 = vor.u32 1.1754944e-38, %v405_v29 }
 0x311   :  { %v337_v11 = vmul.f32 %v569_v33, %v336_v1  ;;  %v361_v40 = vor.u32 1.1754944e-38, %v360_v30  ;;  %vm404_vm15 = vcmp.eq.f32.partialorder %v403_v32, 8.507059e+37  ;;  %vm359_vm0 = vcmp.eq.f32.partialorder %v358_v35, 8.507059e+37  ;;  %v495_v1 = vld [vmem:[%s833_s5 + $0x30] sm:$0xff] }
 0x312   :  { %v295_v12 = vpop.xlane.xlu2 %294  ;;  %v383_v13 = vadd.f32 %v567_v53, %v382_v8 }
 0x313   :  { %v571_v14 = vpop.eup %570  ;;  %v303_v15 = vmax.f32 %v295_v12, 1e-09  ;;  %v338_v46 = vadd.f32 %v569_v33, %v337_v11 }
 0x314   :  { %v573_v17 = vpop.eup %572  ;;  %v395_v18 = vmul.f32 %v571_v14, %v766_v55  ;;  %v387_v20 = vsel %vm386_vm6, %v567_v53, %v383_v13  ;;  %vm400_vm9 = vweird.f32 %v571_v14 }
 0x315   :  { %v350_v21 = vmul.f32 %v573_v17, %v769_v60  ;;  %574 = vrcp.f32 %v303_v15  ;;  %v342_v22 = vsel %vm341_vm7, %v569_v33, %v338_v46  ;;  %v392_v23 = vsel %vm389_vm8, %v391_v16, %v387_v20  ;;  %vm401_vm13 = vmor %vm399_vm11, %vm400_vm9  ;;  %v489_v60 = vld [vmem:[%s833_s5] sm:$0xff]  ;;  %v496_v16 = vld [vmem:[%s833_s5 + $0x38] sm:$0xff] }
 0x316   :  { %v396_v24 = vsub.f32 1.0, %v395_v18  ;;  %v347_v25 = vsel %vm344_vm5, %v346_v19, %v342_v22  ;;  %v393_v26 = vmul.f32 %v392_v23, %v731_v57  ;;  %vm355_vm10 = vweird.f32 %v573_v17 }
 0x317   :  { %v351_v27 = vsub.f32 1.0, %v350_v21  ;;  %v348_v28 = vmul.f32 %v347_v25, %v729_v56  ;;  %vm356_vm14 = vmor %vm354_vm12, %vm355_vm10  ;;  %v420_v49 = vand.u32 2147483648, %v303_v15  ;;  %v418_v51 = vand.u32 2147483647, %v303_v15 }
 0x318   :  { %526 = vmatmul.msk.f32.gmra.mxu3 %vm207_vm2, %v393_v26  ;;  %v397_v31 = vmul.f32 %v571_v14, %v396_v24  ;;  %vm414_vm4 = vweird.f32 %v303_v15 }
 0x319   :  { %523 = vmatmul.msk.f32.gmra.mxu2 %vm207_vm2, %v348_v28  ;;  %v352_v34 = vmul.f32 %v573_v17, %v351_v27  ;;  %v421_v53 = vor.u32 1.1754944e-38, %v420_v49  ;;  %vm419_vm6 = vcmp.eq.f32.partialorder %v418_v51, 8.507059e+37 }
 0x31a   :  { %v398_v57 = vadd.f32 %v571_v14, %v397_v31 }
 0x31b   :  { %v575_v56 = vpop.eup %574  ;;  %v353_v37 = vadd.f32 %v573_v17, %v352_v34 }
 0x31c   :  { %v410_v39 = vmul.f32 %v575_v56, %v303_v15  ;;  %v402_v41 = vsel %vm401_vm13, %v571_v14, %v398_v57  ;;  %vm415_vm3 = vweird.f32 %v575_v56  ;;  %v494_v15 = vld [vmem:[%s833_s5 + $0x28] sm:$0xff] }
 0x31d   :  { %v357_v42 = vsel %vm356_vm14, %v573_v17, %v353_v37  ;;  %v407_v43 = vsel %vm404_vm15, %v406_v38, %v402_v41  ;;  %vm416_vm5 = vmor %vm414_vm4, %vm415_vm3 }
 0x31e   :  { %v411_v44 = vsub.f32 1.0, %v410_v39  ;;  %v362_v45 = vsel %vm359_vm0, %v361_v40, %v357_v42  ;;  %v408_v47 = vmul.f32 %v407_v43, %v746_v4 }
 0x31f   :  { %v363_v48 = vmul.f32 %v362_v45, %v744_v3 }
 0x320   :  { %527 = vmatmul.msk.f32.gmra.mxu3 %vm207_vm2, %v408_v47  ;;  %v412_v50 = vmul.f32 %v575_v56, %v411_v44 }
 0x321   :  { %524 = vmatmul.msk.f32.gmra.mxu2 %vm207_vm2, %v363_v48 }
 0x322   :  { %v413_v52 = vadd.f32 %v575_v56, %v412_v50 }
 0x324   :  { %v417_v54 = vsel %vm416_vm5, %v575_v56, %v413_v52 }
 0x325   :  { %v422_v55 = vsel %vm419_vm6, %v421_v53, %v417_v54 }
 0x326   :  { %v423_v58 = vmul.f32 %v422_v55, %v755_v9  ;;  %v493_v9 = vld [vmem:[%s833_s5 + $0x20] sm:$0xff] }
 0x328   :  { %528 = vmatmul.msk.f32.gmra.mxu3 %vm207_vm2, %v423_v58 }
 0x38a   :  { %v477_v4 = vpop.f32.mrf.mxu3 }
 0x38b   :  { %v465_v3 = vpop.f32.mrf.mxu2  ;;  %v501_v2 = vmul.f32 %v493_v9, %v477_v4 }
 0x38c   :  { %v497_v63 = vmul.f32 %v489_v60, %v465_v3 }
 0x393   :  { %v468_v33 = vpop.f32.mrf.mxu2 }
 0x394   :  { %v498_v13 = vmul.f32 %v490_v6, %v468_v33 }
 0x39b   :  { %v480_v36 = vpop.f32.mrf.mxu3 }
 0x39c   :  { %v471_v61 = vpop.f32.mrf.mxu2  ;;  %v502_v17 = vmul.f32 %v494_v15, %v480_v36 }
 0x39d   :  { %v499_v62 = vmul.f32 %v491_v59, %v471_v61 }
 0x39f   :  { %v505_v0 = vadd.f32 %v499_v62, %v497_v63 }
 0x3a1   :  { %v507_v11 = vadd.f32 %v505_v0, %v501_v2 }
 0x3a3   :  { %v483_v7 = vpop.f32.mrf.mxu3 }
 0x3a4   :  { %v474_v8 = vpop.f32.mrf.mxu2  ;;  %v503_v10 = vmul.f32 %v495_v1, %v483_v7 }
 0x3a5   :  { %v500_v12 = vmul.f32 %v492_v5, %v474_v8 }
 0x3a6   :  { %v509_v14 = vadd.f32 %v507_v11, %v503_v10 }
 0x3a7   :  { %v506_v46 = vadd.f32 %v500_v12, %v498_v13 }
 0x3a8   :  { %511 = vst.msk [vmem:[%s834_s6] sm:$0xff] %vm67_vm1, %v509_v14 }
 0x3a9   :  { %v508_v20 = vadd.f32 %v506_v46, %v502_v17 }
 0x3ab   :  { %v486_v18 = vpop.f32.mrf.mxu3 }
 0x3ac   :  { %v504_v19 = vmul.f32 %v496_v16, %v486_v18 }
 0x3ae   :  { %v510_v21 = vadd.f32 %v508_v20, %v504_v19 }
 0x3b0   :  { %512 = vst.msk [vmem:[%s834_s6 + $0x8] sm:$0xff] %vm67_vm1, %v510_v21 }

</bundles_post_ra>
